<compile_context>
chip_gen: v6e
topology: v6e:2x2x1
jax: 0.10.0
libtpu: 0.0.40
codegen_flags: <defaults>
</compile_context>

<pallas_src>
import functools

import jax
import jax.numpy as jnp
from jax.experimental import pallas as pl
from jax.experimental.pallas import tpu as pltpu


LEAKY_SLOPE = 0.01  # torch.nn.LeakyReLU default negative_slope
LANE = 128          # vreg lane width
SUBLANE = 8         # vreg sublane count (f32)


def _round_up(x: int, m: int) -> int:
    return ((x + m - 1) // m) * m


def _make_mlp_kernel(num_layers: int, negative_slope: float = LEAKY_SLOPE):
    """Fused-MLP kernel body: (x, W1, b1, ..., Wn, bn, out)."""

    def kernel(x_ref, *refs):
        out_ref = refs[-1]
        param_refs = refs[:-1]

        h = x_ref[...]  # bf16 activations feed the MXU directly
        for i in range(num_layers):
            w = param_refs[2 * i][...]      # bf16 weights (lane-padded, VMEM-resident)
            b = param_refs[2 * i + 1][...]  # f32 bias (VPU elementwise path)
            # bf16 x bf16 -> f32 accumulation on the MXU; bias broadcasts over batch.
            acc = jnp.dot(h, w, preferred_element_type=jnp.float32) + b
            if i < num_layers - 1:
                # LeakyReLU in f32 on the VPU: max(x, slope*x) (slope < 1).
                acc = jnp.maximum(acc, negative_slope * acc)
                h = acc.astype(x_ref.dtype)  # back to bf16 for the next MXU pass
            else:
                h = acc  # final activation: 'none' -> identity, keep f32
        out_ref[...] = h.astype(out_ref.dtype)

    return kernel


def init_dense_network_params(
    key,
    size_in: int,
    hidden_shape,
    out_channels: int = 1,
    size_out: int | None = None,
    dtype=jnp.float32,
):
    """Deterministic init matching torch.nn.Linear shapes (weights pre-transposed)."""
    if size_out is None:
        size_out = size_in * out_channels
    assert size_out % out_channels == 0
    network_shape = [size_in, *hidden_shape, size_out]

    params = []
    for f_in, f_out in zip(network_shape[:-1], network_shape[1:]):
        key, wk, bk = jax.random.split(key, 3)
        bound = 1.0 / jnp.sqrt(jnp.asarray(f_in, jnp.float32))
        # PyTorch Linear weight is (f_out, f_in); store transposed (f_in, f_out).
        w = jax.random.uniform(wk, (f_in, f_out), dtype, -bound, bound)
        # Bias kept 2-D (1, f_out) so it lives nicely on the (sublane, lane) grid.
        b = jax.random.uniform(bk, (1, f_out), dtype, -bound, bound)
        params.append((w, b))
    return params, size_out


@functools.partial(
    jax.jit, static_argnames=("out_channels", "size_out", "batch_tile")
)
def dense_neural_network(
    v_in, params, out_channels: int, size_out: int, batch_tile: int = 512
):
    """Forward pass: v_in (n_batch, size_in) -> (n_batch, out_channels, size_out//out_channels)."""
    n_batch, size_in = v_in.shape
    num_layers = len(params)
    out_dtype = v_in.dtype

    # ---- feature padding to lane multiples (lane-dense loads/stores) --------
    dims = [size_in] + [w.shape[1] for (w, _b) in params]
    dims_pad = [_round_up(d, LANE) for d in dims]
    size_in_pad, size_out_pad = dims_pad[0], dims_pad[-1]

    # ---- batch tiling --------------------------------------------------------
    tb = min(batch_tile, _round_up(n_batch, SUBLANE))   # multiple of 8
    n_batch_pad = _round_up(n_batch, tb)
    grid = (n_batch_pad // tb,)

    # ---- pad + cast input: bf16 MXU operands, zero-padded batch/features ----
    x = jnp.pad(v_in, ((0, n_batch_pad - n_batch), (0, size_in_pad - size_in)))
    x = x.astype(jnp.bfloat16)

    # ---- pad + cast params: bf16 weights, f32 biases -------------------------
    flat_params = []
    in_specs = [pl.BlockSpec((tb, size_in_pad), lambda i: (i, 0))]
    for li, (w, b) in enumerate(params):
        f_in, f_out = w.shape
        f_in_p, f_out_p = dims_pad[li], dims_pad[li + 1]
        w_p = jnp.pad(w, ((0, f_in_p - f_in), (0, f_out_p - f_out))).astype(jnp.bfloat16)
        b_p = jnp.pad(b, ((0, 0), (0, f_out_p - f_out))).astype(jnp.float32)
        flat_params.extend([w_p, b_p])
        # Constant index_map -> weights/biases DMA'd once, stay VMEM-resident
        # across the whole batch grid.
        in_specs.append(pl.BlockSpec((f_in_p, f_out_p), lambda i: (0, 0)))
        in_specs.append(pl.BlockSpec((1, f_out_p), lambda i: (0, 0)))

    # ---- cost estimate (helps XLA schedule around this custom call) ---------
    flops = 2 * n_batch_pad * sum(a * b for a, b in zip(dims_pad[:-1], dims_pad[1:]))
    bytes_accessed = (
        x.size * x.dtype.itemsize
        + sum(int(p.size) * p.dtype.itemsize for p in flat_params)
        + n_batch_pad * size_out_pad * jnp.dtype(out_dtype).itemsize
    )

    # ---- VMEM budget: resident params + double-buffered act/out tiles -------
    param_bytes = sum(int(p.size) * p.dtype.itemsize for p in flat_params)
    act_bytes = 2 * tb * size_in_pad * 2  # double-buffered bf16 input tile
    out_bytes = 2 * tb * size_out_pad * jnp.dtype(out_dtype).itemsize
    interm_bytes = 2 * tb * max(dims_pad) * 4  # f32 intermediates headroom
    needed = param_bytes + act_bytes + out_bytes + interm_bytes
    # Cap at 48 MiB so the request is valid on v7x (64 MiB physical VMEM).
    vmem_limit = int(min(max(2 * needed, 32 * 1024 * 1024), 48 * 1024 * 1024))

    kernel = _make_mlp_kernel(num_layers)

    out_padded = pl.pallas_call(
        kernel,
        out_shape=jax.ShapeDtypeStruct((n_batch_pad, size_out_pad), out_dtype),
        grid=grid,
        in_specs=in_specs,
        out_specs=pl.BlockSpec((tb, size_out_pad), lambda i: (i, 0)),
        compiler_params=pltpu.CompilerParams(
            dimension_semantics=("parallel",),  # megacore sharding on v7x
            vmem_limit_bytes=vmem_limit,
        ),
        cost_estimate=pl.CostEstimate(
            flops=flops, transcendentals=0, bytes_accessed=bytes_accessed
        ),
    )(x, *flat_params)

    out = out_padded[:n_batch, :size_out]
    return out.reshape(n_batch, out_channels, size_out // out_channels)


# ----------------------------- references ------------------------------------
def _reference_forward_f32(v_in, params, out_channels, size_out):
    """Pure-JAX f32 reference mirroring the PyTorch module semantics."""
    h = v_in
    for i, (w, b) in enumerate(params):
        h = h @ w + b
        if i < len(params) - 1:
            h = jnp.where(h >= 0, h, LEAKY_SLOPE * h)
    return h.reshape(-1, out_channels, size_out // out_channels)


def _reference_forward_bf16(v_in, params, out_channels, size_out):
    """Pure-JAX reference mirroring the kernel arithmetic (bf16 MXU operands, f32 accum)."""
    h = v_in.astype(jnp.bfloat16)
    for i, (w, b) in enumerate(params):
        acc = jnp.dot(
            h, w.astype(jnp.bfloat16), preferred_element_type=jnp.float32
        ) + b.astype(jnp.float32)
        if i < len(params) - 1:
            acc = jnp.maximum(acc, LEAKY_SLOPE * acc)
            h = acc.astype(jnp.bfloat16)
        else:
            h = acc
    return h.reshape(-1, out_channels, size_out // out_channels)


if __name__ == "__main__":
    # Small config consistent with the module:
    #   size_in=16, hidden_shape=(32, 32), activation='leaky_relu',
    #   final_activation='none', use_bias=True, out_channels=2, size_out=32
    n_batch = 8
    size_in = 16
    hidden_shape = (32, 32)
    out_channels = 2
    size_out = 32

    key = jax.random.PRNGKey(0)
    key, pkey, xkey = jax.random.split(key, 3)

    params, size_out = init_dense_network_params(
        pkey, size_in, hidden_shape, out_channels=out_channels, size_out=size_out
    )
    v_in = jax.random.normal(xkey, (n_batch, size_in), jnp.float32)

    out = dense_neural_network(
        v_in, params, out_channels=out_channels, size_out=size_out
    )
    out = jax.block_until_ready(out)

    expected_shape = (n_batch, out_channels, size_out // out_channels)
    assert out.shape == expected_shape, (out.shape, expected_shape)

    # Tight check against a reference that mirrors the kernel arithmetic
    # (bf16 operands, f32 accumulation).
    ref_bf16 = _reference_forward_bf16(v_in, params, out_channels, size_out)
    assert jnp.allclose(out, ref_bf16, atol=1e-3, rtol=1e-3), "mismatch vs bf16 reference"

    # Loose check against the full-f32 PyTorch-equivalent math (bf16 rounding
    # of MXU operands is the only expected difference).
    ref_f32 = _reference_forward_f32(v_in, params, out_channels, size_out)
    assert jnp.allclose(out, ref_f32, atol=5e-2, rtol=5e-2), "mismatch vs f32 reference"

    print("KERNEL_OK")
</pallas_src>

<mosaic_0001>
module attributes {stable_mosaic.version = 11 : i64} {
  func.func @kernel(%arg0: i32, %arg1: memref<8x128xbf16, #tpu.memory_space<vmem>>, %arg2: memref<128x128xbf16, #tpu.memory_space<vmem>>, %arg3: memref<1x128xf32, #tpu.memory_space<vmem>>, %arg4: memref<128x128xbf16, #tpu.memory_space<vmem>>, %arg5: memref<1x128xf32, #tpu.memory_space<vmem>>, %arg6: memref<128x128xbf16, #tpu.memory_space<vmem>>, %arg7: memref<1x128xf32, #tpu.memory_space<vmem>>, %arg8: memref<8x128xf32, #tpu.memory_space<vmem>>) attributes {dimension_semantics = [#tpu.dimension_semantics<parallel>], iteration_bounds = array<i64: 1>, scalar_prefetch = 0 : i64, scratch_operands = 0 : i64, tpu.core_type = #tpu.core_type<tc>, window_params = [{transform_indices = @transform_0, window_bounds = array<i64: 8, 128>}, {pipeline_mode = #tpu.pipeline_mode<synchronous>, transform_indices = @transform_1, window_bounds = array<i64: 128, 128>}, {pipeline_mode = #tpu.pipeline_mode<synchronous>, transform_indices = @transform_2, window_bounds = array<i64: 1, 128>}, {pipeline_mode = #tpu.pipeline_mode<synchronous>, transform_indices = @transform_3, window_bounds = array<i64: 128, 128>}, {pipeline_mode = #tpu.pipeline_mode<synchronous>, transform_indices = @transform_4, window_bounds = array<i64: 1, 128>}, {pipeline_mode = #tpu.pipeline_mode<synchronous>, transform_indices = @transform_5, window_bounds = array<i64: 128, 128>}, {pipeline_mode = #tpu.pipeline_mode<synchronous>, transform_indices = @transform_6, window_bounds = array<i64: 1, 128>}, {transform_indices = @transform_7, window_bounds = array<i64: 8, 128>}]} {
    %c0 = arith.constant 0 : index
    %c0_0 = arith.constant 0 : index
    %0 = vector.load %arg1[%c0, %c0_0] : memref<8x128xbf16, #tpu.memory_space<vmem>>, vector<8x128xbf16>
    %c0_1 = arith.constant 0 : index
    %c0_2 = arith.constant 0 : index
    %1 = vector.load %arg2[%c0_1, %c0_2] : memref<128x128xbf16, #tpu.memory_space<vmem>>, vector<128x128xbf16>
    %c0_3 = arith.constant 0 : index
    %c0_4 = arith.constant 0 : index
    %2 = vector.load %arg3[%c0_3, %c0_4] : memref<1x128xf32, #tpu.memory_space<vmem>>, vector<1x128xf32>
    %cst = arith.constant dense<0.000000e+00> : vector<8x128xf32>
    %3 = tpu.matmul %0, %1, %cst {dimension_numbers = #tpu.dot_dimension_numbers<[1], [0], [0], [1], [0, 0, 1, 1], [], []>} : vector<8x128xbf16>, vector<128x128xbf16>, vector<8x128xf32> -> vector<8x128xf32>
    %4 = vector.broadcast %2 : vector<1x128xf32> to vector<8x128xf32>
    %5 = arith.addf %3, %4 : vector<8x128xf32>
    %cst_5 = arith.constant 0.00999999977 : f32
    %6 = vector.broadcast %cst_5 : f32 to vector<8x128xf32>
    %7 = arith.mulf %6, %5 : vector<8x128xf32>
    %8 = arith.maximumf %5, %7 : vector<8x128xf32>
    %9 = arith.truncf %8 : vector<8x128xf32> to vector<8x128xbf16>
    %c0_6 = arith.constant 0 : index
    %c0_7 = arith.constant 0 : index
    %10 = vector.load %arg4[%c0_6, %c0_7] : memref<128x128xbf16, #tpu.memory_space<vmem>>, vector<128x128xbf16>
    %c0_8 = arith.constant 0 : index
    %c0_9 = arith.constant 0 : index
    %11 = vector.load %arg5[%c0_8, %c0_9] : memref<1x128xf32, #tpu.memory_space<vmem>>, vector<1x128xf32>
    %cst_10 = arith.constant dense<0.000000e+00> : vector<8x128xf32>
    %12 = tpu.matmul %9, %10, %cst_10 {dimension_numbers = #tpu.dot_dimension_numbers<[1], [0], [0], [1], [0, 0, 1, 1], [], []>} : vector<8x128xbf16>, vector<128x128xbf16>, vector<8x128xf32> -> vector<8x128xf32>
    %13 = vector.broadcast %11 : vector<1x128xf32> to vector<8x128xf32>
    %14 = arith.addf %12, %13 : vector<8x128xf32>
    %cst_11 = arith.constant 0.00999999977 : f32
    %15 = vector.broadcast %cst_11 : f32 to vector<8x128xf32>
    %16 = arith.mulf %15, %14 : vector<8x128xf32>
    %17 = arith.maximumf %14, %16 : vector<8x128xf32>
    %18 = arith.truncf %17 : vector<8x128xf32> to vector<8x128xbf16>
    %c0_12 = arith.constant 0 : index
    %c0_13 = arith.constant 0 : index
    %19 = vector.load %arg6[%c0_12, %c0_13] : memref<128x128xbf16, #tpu.memory_space<vmem>>, vector<128x128xbf16>
    %c0_14 = arith.constant 0 : index
    %c0_15 = arith.constant 0 : index
    %20 = vector.load %arg7[%c0_14, %c0_15] : memref<1x128xf32, #tpu.memory_space<vmem>>, vector<1x128xf32>
    %cst_16 = arith.constant dense<0.000000e+00> : vector<8x128xf32>
    %21 = tpu.matmul %18, %19, %cst_16 {dimension_numbers = #tpu.dot_dimension_numbers<[1], [0], [0], [1], [0, 0, 1, 1], [], []>} : vector<8x128xbf16>, vector<128x128xbf16>, vector<8x128xf32> -> vector<8x128xf32>
    %22 = vector.broadcast %20 : vector<1x128xf32> to vector<8x128xf32>
    %23 = arith.addf %21, %22 : vector<8x128xf32>
    %c0_17 = arith.constant 0 : index
    %c0_18 = arith.constant 0 : index
    %24 = vector.load %arg8[%c0_17, %c0_18] : memref<8x128xf32, #tpu.memory_space<vmem>>, vector<8x128xf32>
    tpu.vector_store %arg8[%c0_17, %c0_18], %23 {strides = array<i32>} : memref<8x128xf32, #tpu.memory_space<vmem>>, vector<8x128xf32>,
    return
  }
  func.func @transform_0(%arg0: i32) -> (i32, i32) {
    %c0_i32 = arith.constant 0 : i32
    %c0_i32_0 = arith.constant 0 : i32
    return %arg0, %c0_i32 : i32, i32
  }
  func.func @transform_1(%arg0: i32) -> (i32, i32) {
    %c0_i32 = arith.constant 0 : i32
    %c0_i32_0 = arith.constant 0 : i32
    %c0_i32_1 = arith.constant 0 : i32
    return %c0_i32, %c0_i32_0 : i32, i32
  }
  func.func @transform_2(%arg0: i32) -> (i32, i32) {
    %c0_i32 = arith.constant 0 : i32
    %c0_i32_0 = arith.constant 0 : i32
    %c0_i32_1 = arith.constant 0 : i32
    return %c0_i32, %c0_i32_0 : i32, i32
  }
  func.func @transform_3(%arg0: i32) -> (i32, i32) {
    %c0_i32 = arith.constant 0 : i32
    %c0_i32_0 = arith.constant 0 : i32
    %c0_i32_1 = arith.constant 0 : i32
    return %c0_i32, %c0_i32_0 : i32, i32
  }
  func.func @transform_4(%arg0: i32) -> (i32, i32) {
    %c0_i32 = arith.constant 0 : i32
    %c0_i32_0 = arith.constant 0 : i32
    %c0_i32_1 = arith.constant 0 : i32
    return %c0_i32, %c0_i32_0 : i32, i32
  }
  func.func @transform_5(%arg0: i32) -> (i32, i32) {
    %c0_i32 = arith.constant 0 : i32
    %c0_i32_0 = arith.constant 0 : i32
    %c0_i32_1 = arith.constant 0 : i32
    return %c0_i32, %c0_i32_0 : i32, i32
  }
  func.func @transform_6(%arg0: i32) -> (i32, i32) {
    %c0_i32 = arith.constant 0 : i32
    %c0_i32_0 = arith.constant 0 : i32
    %c0_i32_1 = arith.constant 0 : i32
    return %c0_i32, %c0_i32_0 : i32, i32
  }
  func.func @transform_7(%arg0: i32) -> (i32, i32) {
    %c0_i32 = arith.constant 0 : i32
    %c0_i32_0 = arith.constant 0 : i32
    return %arg0, %c0_i32 : i32, i32
  }
}

</mosaic_0001>

<bundles_post_ra>
// kernel: dense_neural_network.1
= control target key start
LH: loop header
LB: loop body
LE: loop exit
PB: predicated region body
PF: predicated region fallthrough
CT: control target
= control target key end

     0   :  { %v512_v0 = vmov 0.0   ;;  %vm513_vm0 = vmmov 0   ;;  %s671_s1 = inlined_call_operand.vmem [shape: bf16[128,128], index: 1, kind: input, shape index: {}]   ;;  %s672_s3 = inlined_call_operand.vmem [shape: bf16[128,128], index: 3, kind: input, shape index: {}]   ;;  %s673_s0 = inlined_call_operand.vmem [shape: bf16[8,128], index: 0, kind: input, shape index: {}]   ;;  %s674_s5 = inlined_call_operand.vmem [shape: bf16[128,128], index: 5, kind: input, shape index: {}]   ;;  %s675_s2 = inlined_call_operand.vmem [shape: f32[1,128], index: 2, kind: input, shape index: {}]   ;;  %s676_s4 = inlined_call_operand.vmem [shape: f32[1,128], index: 4, kind: input, shape index: {}]   ;;  %s677_s6 = inlined_call_operand.vmem [shape: f32[1,128], index: 6, kind: input, shape index: {}]   ;;  %s678_s7 = inlined_call_operand.vmem [shape: f32[8,128], index: 7, kind: output, shape index: {}]  }
   0x1   :  { %426 = vmatprep.subr.bf16.mxu0 %v512_v0  ;;  %v488_v1 = vld [vmem:[%s671_s1 + $0x38] sm:$0xff]   ;;  %442 = vmatprep.mubr.msk.bf16.mxu0 %vm513_vm0, %v512_v0  ;;  %v489_v2 = vld [vmem:[%s671_s1 + $0x30] sm:$0xff]   ;;  %v490_v3 = vld [vmem:[%s671_s1 + $0x28] sm:$0xff]  }
   0x2   :  { %446 = vmatprep.subr.bf16.mxu1 %v512_v0  ;;  %462 = vmatprep.mubr.msk.bf16.mxu1 %vm513_vm0, %v512_v0  ;;  %v496_v4 = vld [vmem:[%s672_s3 + $0x38] sm:$0xff]   ;;  %v491_v5 = vld [vmem:[%s671_s1 + $0x20] sm:$0xff]   ;;  %v497_v6 = vld [vmem:[%s672_s3 + $0x30] sm:$0xff]  }
   0x3   :  { %427 = vmatpush3.bf16.msra.mxu0 %v488_v1  ;;  %447 = vmatpush3.bf16.msra.mxu1 %v496_v4  ;;  %v492_v7 = vld [vmem:[%s671_s1 + $0x18] sm:$0xff]   ;;  %v498_v8 = vld [vmem:[%s672_s3 + $0x28] sm:$0xff]   ;;  %v493_v9 = vld [vmem:[%s671_s1 + $0x10] sm:$0xff]  }
   0x4   :  { %428 = vmatprep.subr.bf16.mxu0 %v512_v0  ;;  %448 = vmatprep.subr.bf16.mxu1 %v512_v0  ;;  %v499_v10 = vld [vmem:[%s672_s3 + $0x20] sm:$0xff]   ;;  %v494_v11 = vld [vmem:[%s671_s1 + $0x8] sm:$0xff]   ;;  %v500_v12 = vld [vmem:[%s672_s3 + $0x18] sm:$0xff]  }
   0x5   :  { %v495_v13 = vld [vmem:[%s671_s1] sm:$0xff]   ;;  %v501_v14 = vld [vmem:[%s672_s3 + $0x10] sm:$0xff]   ;;  %v502_v16 = vld [vmem:[%s672_s3 + $0x8] sm:$0xff]  }
   0x6   :  { %v27_v15 = vld [vmem:[%s673_s0] sm:$0xf]  ;;  %v504_v18 = vld [vmem:[%s674_s5 + $0x38] sm:$0xff]   ;;  %v505_v19 = vld [vmem:[%s674_s5 + $0x30] sm:$0xff]  }
   0x7   :  { %429 = vmatpush3.bf16.msra.mxu0 %v489_v2  ;;  %449 = vmatpush3.bf16.msra.mxu1 %v497_v6  ;;  %v503_v17 = vld [vmem:[%s672_s3] sm:$0xff]   ;;  %v506_v20 = vld [vmem:[%s674_s5 + $0x28] sm:$0xff]   ;;  %v508_v22 = vld [vmem:[%s674_s5 + $0x18] sm:$0xff]  }
   0x8   :  { %430 = vmatprep.subr.bf16.mxu0 %v512_v0  ;;  %450 = vmatprep.subr.bf16.mxu1 %v512_v0  ;;  %v507_v21 = vld [vmem:[%s674_s5 + $0x20] sm:$0xff]   ;;  %v509_v23 = vld [vmem:[%s674_s5 + $0x10] sm:$0xff]   ;;  %v510_v33 = vld [vmem:[%s674_s5 + $0x8] sm:$0xff]  }
   0x9   :  { %v372_v24 = vld [vmem:[%s675_s2] ss:$0 sm:$0xff] }
   0xa   :  { %v511_v34 = vld [vmem:[%s674_s5] sm:$0xff]  }
   0xb   :  { %431 = vmatpush3.bf16.msra.mxu0 %v490_v3  ;;  %451 = vmatpush3.bf16.msra.mxu1 %v498_v8  ;;  %v381_v35 = vld [vmem:[%s676_s4] ss:$0 sm:$0xff] }
   0xc   :  { %432 = vmatprep.subr.bf16.mxu0 %v512_v0  ;;  %452 = vmatprep.subr.bf16.mxu1 %v512_v0  ;;  %v390_v44 = vld [vmem:[%s677_s6] ss:$0 sm:$0xff] }
   0xf   :  { %433 = vmatpush3.bf16.msra.mxu0 %v491_v5  ;;  %453 = vmatpush3.bf16.msra.mxu1 %v499_v10 }
  0x10   :  { %434 = vmatprep.subr.bf16.mxu0 %v512_v0  ;;  %454 = vmatprep.subr.bf16.mxu1 %v512_v0 }
  0x13   :  { %435 = vmatpush3.bf16.msra.mxu0 %v492_v7  ;;  %455 = vmatpush3.bf16.msra.mxu1 %v500_v12 }
  0x14   :  { %436 = vmatprep.subr.bf16.mxu0 %v512_v0  ;;  %456 = vmatprep.subr.bf16.mxu1 %v512_v0 }
  0x17   :  { %437 = vmatpush3.bf16.msra.mxu0 %v493_v9  ;;  %457 = vmatpush3.bf16.msra.mxu1 %v501_v14 }
  0x18   :  { %438 = vmatprep.subr.bf16.mxu0 %v512_v0  ;;  %458 = vmatprep.subr.bf16.mxu1 %v512_v0 }
  0x1b   :  { %439 = vmatpush3.bf16.msra.mxu0 %v494_v11  ;;  %459 = vmatpush3.bf16.msra.mxu1 %v502_v16 }
  0x1c   :  { %440 = vmatprep.subr.bf16.mxu0 %v512_v0  ;;  %460 = vmatprep.subr.bf16.mxu1 %v512_v0 }
  0x1f   :  { %441 = vmatpush3.bf16.msra.mxu0 %v495_v13  ;;  %461 = vmatpush3.bf16.msra.mxu1 %v503_v17 }
  0x20   :  { %466 = vmatprep.subr.bf16.mxu0 %v512_v0 }
  0x22   :  { %443 = vmatmul.mubr.bf16.vlgmr.msra.gmra.mxu0 %v27_v15 }
  0x23   :  { %482 = vmatprep.mubr.msk.bf16.mxu0 %vm513_vm0, %v512_v0  ;;  %467 = vmatpush3.bf16.msra.mxu0 %v504_v18 }
  0x24   :  { %468 = vmatprep.subr.bf16.mxu0 %v512_v0 }
  0x27   :  { %469 = vmatpush3.bf16.msra.mxu0 %v505_v19 }
  0x28   :  { %470 = vmatprep.subr.bf16.mxu0 %v512_v0 }
  0x2b   :  { %471 = vmatpush3.bf16.msra.mxu0 %v506_v20 }
  0x2c   :  { %472 = vmatprep.subr.bf16.mxu0 %v512_v0 }
  0x2f   :  { %473 = vmatpush3.bf16.msra.mxu0 %v507_v21 }
  0x30   :  { %474 = vmatprep.subr.bf16.mxu0 %v512_v0 }
  0x33   :  { %475 = vmatpush3.bf16.msra.mxu0 %v508_v22 }
  0x34   :  { %476 = vmatprep.subr.bf16.mxu0 %v512_v0 }
  0x37   :  { %477 = vmatpush3.bf16.msra.mxu0 %v509_v23 }
  0x38   :  { %478 = vmatprep.subr.bf16.mxu0 %v512_v0 }
  0x3b   :  { %479 = vmatpush3.bf16.msra.mxu0 %v510_v33 }
  0x3c   :  { %480 = vmatprep.subr.bf16.mxu0 %v512_v0 }
  0x3f   :  { %481 = vmatpush3.bf16.msra.mxu0 %v511_v34 }
  0xe2   :  { %v133_v25 = vpop.f32.mrf.mxu0 }
  0xe3   :  { %v134_v26 = vadd.f32 %v372_v24, %v133_v25 }
  0xe4   :  { %v444_v27 = vpop.f32.mrf.mxu0 }
  0xe5   :  { %v139_v28 = vmul.f32 0.01, %v134_v26 }
  0xe6   :  { %v136_v29 = vpop.f32.mrf.mxu0 }
  0xe7   :  { %v140_v30 = vmax.f32 %v134_v26, %v139_v28 }
  0xe8   :  { %v445_v31 = vpop.f32.mrf.mxu0 }
  0xe9   :  { %v141_v32 = vpack.c.bf16 %v140_v30, %v140_v30 }
  0xeb   :  { %463 = vmatmul.mubr.bf16.vlgmr.msra.gmra.mxu1 %v141_v32 }
 0x1ab   :  { %v247_v36 = vpop.f32.mrf.mxu1 }
 0x1ac   :  { %v248_v37 = vadd.f32 %v381_v35, %v247_v36 }
 0x1ad   :  { %v464_v38 = vpop.f32.mrf.mxu1 }
 0x1ae   :  { %v253_v39 = vmul.f32 0.01, %v248_v37 }
 0x1af   :  { %v250_v40 = vpop.f32.mrf.mxu1 }
 0x1b0   :  { %v254_v41 = vmax.f32 %v248_v37, %v253_v39 }
 0x1b1   :  { %v465_v42 = vpop.f32.mrf.mxu1 }
 0x1b2   :  { %v255_v43 = vpack.c.bf16 %v254_v41, %v254_v41 }
 0x1b4   :  { %483 = vmatmul.mubr.bf16.vlgmr.msra.gmra.mxu0 %v255_v43 }
 0x274   :  { %v361_v45 = vpop.f32.mrf.mxu0 }
 0x275   :  { %v362_v46 = vadd.f32 %v390_v44, %v361_v45 }
 0x276   :  { %v484_v47 = vpop.f32.mrf.mxu0 }
 0x277   :  { %367 = vst [vmem:[%s678_s7] sm:$0xff] %v362_v46 }
 0x278   :  { %v364_v48 = vpop.f32.mrf.mxu0 }
 0x27a   :  { %v485_v49 = vpop.f32.mrf.mxu0 }

</bundles_post_ra>
